<compile_context>
chip_gen: v7x
topology: tpu7x:2x2x1
jax: 0.10.0
libtpu: 0.0.40
codegen_flags: <defaults>
</compile_context>

<pallas_src>
import jax
import jax.numpy as jnp
from jax.experimental import pallas as pl
from jax.experimental.pallas import tpu as pltpu


def _round_up(n: int, m: int) -> int:
    return ((n + m - 1) // m) * m


def _choose_tile_b(b: int, f: int, h: int, x_itemsize: int, out_itemsize: int,
                   align: int, vmem_budget_bytes: int = 32 << 20) -> int:
    """Pick a batch tile that fits the VMEM budget with double-buffering everywhere."""
    hf = h + 1                                       # fused width: features | logit
    # Pallas double-buffers every input, even with a constant index_map.
    weight_bytes = 2 * (f * hf * x_itemsize + hf * 4)
    # Pipelined per-row cost: x tile + features tile + classifier column, 2 buffers each.
    per_row = 2 * (f * x_itemsize + h * out_itemsize + 4)
    avail = max(vmem_budget_bytes - weight_bytes, per_row * align)
    tile = min(avail // per_row, 1024)
    # Guarantee >=2 grid steps whenever possible so ("parallel",) can shard the
    # batch tiles across both v7x TensorCores.
    tile = min(tile, _round_up(pl.cdiv(b, 2), align), _round_up(b, align))
    tile = max(align, (tile // align) * align)
    return int(tile)


def _vmem_limit_bytes(tile_b: int, f: int, h: int, x_itemsize: int, out_itemsize: int) -> int:
    hf = h + 1
    need = (2 * (f * hf * x_itemsize + hf * 4)                        # fused weight + bias (double-buffered)
            + 2 * tile_b * (f * x_itemsize + h * out_itemsize + 4)    # x, features, classifier (double-buffered)
            + (2 << 20))                                              # headroom for internal scratch
    # Stay below every generation's physical VMEM (v7x: 64 MiB per TensorCore).
    return int(min(max(need, 4 << 20), 48 << 20))


def _disc_fused_kernel(x_ref, w_ref, b_ref, feat_ref, cls_ref):
    h = feat_ref.shape[-1]
    # ONE MXU matmul covers fc1 AND the (algebraically fused) classifier column.
    y = jnp.dot(x_ref[...], w_ref[...], preferred_element_type=jnp.float32)
    y = y + b_ref[...]                                   # f32 bias row (b1 | fused logit bias)
    feat_ref[...] = y[:, :h].astype(feat_ref.dtype)      # fc1 features, written directly
    # Sigmoid only on the single logit column (tiny EUP cost), stored as (tile_b, 1).
    cls_ref[...] = jax.nn.sigmoid(y[:, h:h + 1]).astype(cls_ref.dtype)


def build_discriminator_params(w1, b1, wc, bc, *, use_bf16=True):
    """Fold the width-1 classifier matmul into the feature matmul (build once, reuse).

        sigmoid((x @ w1 + b1) @ wc + bc) == sigmoid(x @ (w1 @ wc) + (b1 @ wc + bc))

    Returns
      w_fused : (F, H+1)  columns [0:H] = w1, column H = w1 @ wc    (bf16 or f32)
      b_fused : (1, H+1)  columns [0:H] = b1, column H = b1 @ wc + bc   (f32)
    """
    f, h = w1.shape
    assert b1.shape == (1, h) and wc.shape == (h, 1) and bc.shape == (1, 1)
    hi = jax.lax.Precision.HIGHEST
    w1 = w1.astype(jnp.float32)
    b1 = b1.astype(jnp.float32)
    wc = wc.astype(jnp.float32)
    bc = bc.astype(jnp.float32)
    in_dtype = jnp.bfloat16 if use_bf16 else jnp.float32
    w_cls = jnp.dot(w1, wc, precision=hi)                       # (F, 1)
    b_cls = jnp.dot(b1, wc, precision=hi) + bc                  # (1, 1)
    w_fused = jnp.concatenate([w1, w_cls], axis=1).astype(in_dtype)
    b_fused = jnp.concatenate([b1, b_cls], axis=1)              # stays f32
    return w_fused, b_fused


def discriminator_net_fused(x, w_fused, b_fused, *, tile_b=None, out_dtype=None):
    """Forward pass from prebuilt fused parameters.  Returns (classifier, features)."""
    B, F = x.shape
    Hf = w_fused.shape[1]
    H = Hf - 1
    assert w_fused.shape == (F, Hf) and b_fused.shape == (1, Hf)

    in_dtype = jnp.dtype(w_fused.dtype)
    if out_dtype is None:
        out_dtype = jnp.bfloat16 if in_dtype == jnp.bfloat16 else jnp.float32
    out_dtype = jnp.dtype(out_dtype)
    x_in = x.astype(in_dtype)

    x_isz = in_dtype.itemsize
    o_isz = out_dtype.itemsize
    align = 16 if (in_dtype == jnp.bfloat16 or out_dtype == jnp.bfloat16) else 8

    if tile_b is None:
        tile_b = _choose_tile_b(B, F, H, x_isz, o_isz, align)
    else:
        tile_b = max(align, _round_up(int(tile_b), align))
        tile_b = min(tile_b, _round_up(B, align))

    grid = (pl.cdiv(B, tile_b),)   # ragged B handled by the clipped edge block (no jnp.pad copy)

    feat, cls = pl.pallas_call(
        _disc_fused_kernel,
        out_shape=(jax.ShapeDtypeStruct((B, H), out_dtype),
                   jax.ShapeDtypeStruct((B, 1), jnp.float32)),
        grid=grid,
        in_specs=[
            pl.BlockSpec((tile_b, F), lambda i: (i, 0)),   # x: streamed per batch tile
            pl.BlockSpec((F, Hf), lambda i: (0, 0)),       # fused weight: VMEM-resident
            pl.BlockSpec((1, Hf), lambda i: (0, 0)),       # fused bias row: VMEM-resident
        ],
        out_specs=(
            pl.BlockSpec((tile_b, H), lambda i: (i, 0)),   # features, no zero-pad columns
            pl.BlockSpec((tile_b, 1), lambda i: (i, 0)),   # sigmoid(logit)
        ),
        compiler_params=pltpu.CompilerParams(
            dimension_semantics=("parallel",),             # shard batch tiles across TCs (v7x)
            vmem_limit_bytes=_vmem_limit_bytes(tile_b, F, H, x_isz, o_isz),
        ),
    )(x_in, w_fused, b_fused)
    return cls, feat


def discriminator_net(x, w1, b1, wc, bc, *, tile_b=None, use_bf16=True, out_dtype=None):
    """DiscriminatorNet forward pass (linear=True).  Returns (classifier, features).

    x  : (B, n_features)  | w1 : (n_features, n_hidden) | b1 : (1, n_hidden)
    wc : (n_hidden, 1)    | bc : (1, 1)
    """
    # NOTE: for very large n_features the resident (F, H+1) weight should be K-tiled
    # over F with an f32 accumulator (matters for v7x's 64 MiB VMEM); unnecessary at
    # the sizes this module targets.
    w_fused, b_fused = build_discriminator_params(w1, b1, wc, bc, use_bf16=use_bf16)
    return discriminator_net_fused(x, w_fused, b_fused, tile_b=tile_b, out_dtype=out_dtype)


def _reference(x, w1, b1, wc, bc):
    hi = jax.lax.Precision.HIGHEST
    h = jnp.dot(x, w1, precision=hi) + b1
    c = jax.nn.sigmoid(jnp.dot(h, wc, precision=hi) + bc)
    return c, h


if __name__ == "__main__":
    # Module hyperparameters (linear=True => len(n_hidden_features) == 1).
    batch = 16
    n_features = 32
    n_hidden = 16
    size_z = 8  # unused in forward: fc2 of the linear encoder is sliced off by `[:-1]`

    key = jax.random.PRNGKey(0)
    k_x, k_w1, k_b1, k_wc, k_bc = jax.random.split(key, 5)

    x = jax.random.normal(k_x, (batch, n_features), dtype=jnp.float32)
    # Deterministic parameter init (synthetic; not a checkpoint load).
    w1 = jax.random.normal(k_w1, (n_features, n_hidden), dtype=jnp.float32) * 0.1
    b1 = jax.random.normal(k_b1, (1, n_hidden), dtype=jnp.float32) * 0.1
    wc = jax.random.normal(k_wc, (n_hidden, 1), dtype=jnp.float32) * 0.1
    bc = jax.random.normal(k_bc, (1, 1), dtype=jnp.float32) * 0.1

    cls_ref, feat_ref = _reference(x, w1, b1, wc, bc)

    # 1) f32 path, explicit tile so the demo exercises multiple grid steps (grid=(2,)).
    #    Tolerance 1e-3 covers MXU f32 pass decomposition / fusion summation-order diffs.
    cls, feat = discriminator_net(x, w1, b1, wc, bc, tile_b=8, use_bf16=False)
    jax.block_until_ready((cls, feat))
    assert cls.shape == (batch, 1) and feat.shape == (batch, n_hidden)
    assert jnp.allclose(cls, cls_ref, atol=1e-3, rtol=1e-3), "classifier mismatch (f32)"
    assert jnp.allclose(feat, feat_ref, atol=1e-3, rtol=1e-3), "features mismatch (f32)"

    # 2) Ragged batch: no host-side pad of x, edge block clipped by Pallas.
    cls_r, feat_r = discriminator_net(x[:11], w1, b1, wc, bc, use_bf16=False)
    jax.block_until_ready((cls_r, feat_r))
    assert cls_r.shape == (11, 1) and feat_r.shape == (11, n_hidden)
    assert jnp.allclose(cls_r, cls_ref[:11], atol=1e-3, rtol=1e-3), "classifier mismatch (ragged)"
    assert jnp.allclose(feat_r, feat_ref[:11], atol=1e-3, rtol=1e-3), "features mismatch (ragged)"

    # 3) bf16 fast path (default): fused params built once and reused; bf16 feature output.
    w_f, b_f = build_discriminator_params(w1, b1, wc, bc, use_bf16=True)
    cls_bf, feat_bf = discriminator_net_fused(x, w_f, b_f)
    jax.block_until_ready((cls_bf, feat_bf))
    assert cls_bf.shape == (batch, 1) and feat_bf.shape == (batch, n_hidden)
    assert feat_bf.dtype == jnp.bfloat16 and cls_bf.dtype == jnp.float32
    assert jnp.allclose(cls_bf, cls_ref, atol=5e-2, rtol=5e-2), "classifier mismatch (bf16)"
    assert jnp.allclose(feat_bf.astype(jnp.float32), feat_ref, atol=5e-2, rtol=5e-2), \
        "features mismatch (bf16)"

    print("KERNEL_OK")
</pallas_src>

<mosaic_0001>
module attributes {stable_mosaic.version = 11 : i64} {
  func.func @_disc_fused_kernel(%arg0: i32, %arg1: memref<8x32xf32, #tpu.memory_space<vmem>>, %arg2: memref<32x17xf32, #tpu.memory_space<vmem>>, %arg3: memref<1x17xf32, #tpu.memory_space<vmem>>, %arg4: memref<8x16xf32, #tpu.memory_space<vmem>>, %arg5: memref<8x1xf32, #tpu.memory_space<vmem>>) attributes {dimension_semantics = [#tpu.dimension_semantics<parallel>], iteration_bounds = array<i64: 2>, scalar_prefetch = 0 : i64, scratch_operands = 0 : i64, tpu.core_type = #tpu.core_type<tc>, window_params = [{transform_indices = @transform_0, window_bounds = array<i64: 8, 32>}, {pipeline_mode = #tpu.pipeline_mode<synchronous>, transform_indices = @transform_1, window_bounds = array<i64: 32, 17>}, {pipeline_mode = #tpu.pipeline_mode<synchronous>, transform_indices = @transform_2, window_bounds = array<i64: 1, 17>}, {transform_indices = @transform_3, window_bounds = array<i64: 8, 16>}, {transform_indices = @transform_4, window_bounds = array<i64: 8, 1>}]} {
    %c0 = arith.constant 0 : index
    %c0_0 = arith.constant 0 : index
    %0 = vector.load %arg1[%c0, %c0_0] : memref<8x32xf32, #tpu.memory_space<vmem>>, vector<8x32xf32>
    %c0_1 = arith.constant 0 : index
    %c0_2 = arith.constant 0 : index
    %1 = vector.load %arg2[%c0_1, %c0_2] : memref<32x17xf32, #tpu.memory_space<vmem>>, vector<32x17xf32>
    %cst = arith.constant dense<0.000000e+00> : vector<8x17xf32>
    %2 = tpu.matmul %0, %1, %cst {dimension_numbers = #tpu.dot_dimension_numbers<[1], [0], [0], [1], [0, 0, 1, 1], [], []>} : vector<8x32xf32>, vector<32x17xf32>, vector<8x17xf32> -> vector<8x17xf32>
    %c0_3 = arith.constant 0 : index
    %c0_4 = arith.constant 0 : index
    %3 = vector.load %arg3[%c0_3, %c0_4] : memref<1x17xf32, #tpu.memory_space<vmem>>, vector<1x17xf32>
    %4 = vector.broadcast %3 : vector<1x17xf32> to vector<8x17xf32>
    %5 = arith.addf %2, %4 : vector<8x17xf32>
    %6 = vector.extract_strided_slice %5 {offsets = [0, 0], sizes = [8, 16], strides = [1, 1]} : vector<8x17xf32> to vector<8x16xf32>
    %c0_5 = arith.constant 0 : index
    %c0_6 = arith.constant 0 : index
    %7 = vector.load %arg4[%c0_5, %c0_6] : memref<8x16xf32, #tpu.memory_space<vmem>>, vector<8x16xf32>
    tpu.vector_store %arg4[%c0_5, %c0_6], %6 {strides = array<i32>} : memref<8x16xf32, #tpu.memory_space<vmem>>, vector<8x16xf32>,
    %8 = vector.extract_strided_slice %5 {offsets = [0, 16], sizes = [8, 1], strides = [1, 1]} : vector<8x17xf32> to vector<8x1xf32>
    %9 = arith.negf %8 : vector<8x1xf32>
    %10 = math.exp %9 : vector<8x1xf32>
    %cst_7 = arith.constant 1.000000e+00 : f32
    %11 = vector.broadcast %cst_7 : f32 to vector<8x1xf32>
    %12 = arith.addf %11, %10 : vector<8x1xf32>
    %13 = arith.divf %11, %12 : vector<8x1xf32>
    %c0_8 = arith.constant 0 : index
    %c0_9 = arith.constant 0 : index
    %14 = vector.load %arg5[%c0_8, %c0_9] : memref<8x1xf32, #tpu.memory_space<vmem>>, vector<8x1xf32>
    tpu.vector_store %arg5[%c0_8, %c0_9], %13 {strides = array<i32>} : memref<8x1xf32, #tpu.memory_space<vmem>>, vector<8x1xf32>,
    return
  }
  func.func @transform_0(%arg0: i32) -> (i32, i32) {
    %c0_i32 = arith.constant 0 : i32
    %c0_i32_0 = arith.constant 0 : i32
    return %arg0, %c0_i32 : i32, i32
  }
  func.func @transform_1(%arg0: i32) -> (i32, i32) {
    %c0_i32 = arith.constant 0 : i32
    %c0_i32_0 = arith.constant 0 : i32
    %c0_i32_1 = arith.constant 0 : i32
    return %c0_i32, %c0_i32_0 : i32, i32
  }
  func.func @transform_2(%arg0: i32) -> (i32, i32) {
    %c0_i32 = arith.constant 0 : i32
    %c0_i32_0 = arith.constant 0 : i32
    %c0_i32_1 = arith.constant 0 : i32
    return %c0_i32, %c0_i32_0 : i32, i32
  }
  func.func @transform_3(%arg0: i32) -> (i32, i32) {
    %c0_i32 = arith.constant 0 : i32
    %c0_i32_0 = arith.constant 0 : i32
    return %arg0, %c0_i32 : i32, i32
  }
  func.func @transform_4(%arg0: i32) -> (i32, i32) {
    %c0_i32 = arith.constant 0 : i32
    %c0_i32_0 = arith.constant 0 : i32
    return %arg0, %c0_i32 : i32, i32
  }
}

</mosaic_0001>

<bundles_post_ra>
// kernel: tpu_custom_call.1
= control target key start
LH: loop header
LB: loop body
LE: loop exit
PB: predicated region body
PF: predicated region fallthrough
CT: control target
= control target key end

     0   :  { %10 = vsyncpa [#allocation3], 0  ;;  %s704_s0 = inlined_call_operand.vmem [shape: f32[16,32], index: 0, kind: input, shape index: {}]   ;;  %s705_s1 = inlined_call_operand.vmem [shape: f32[32,17], index: 1, kind: input, shape index: {}]   ;;  %s706_s2 = inlined_call_operand.vmem [shape: f32[1,17], index: 2, kind: input, shape index: {}]   ;;  %s707_s3 = inlined_call_operand.hbm [shape: f32[16,16], index: 3, kind: output, shape index: {0}]   ;;  %s708_s4 = inlined_call_operand.vmem [shape: f32[16,1], index: 4, kind: output, shape index: {1}]  }
   0x1   :  { %12 = vsyncpa [#allocation3 + $0x1], 0  ;;  %s585_s15 = smov 0   ;;  %s587_s16 = smov 0  }
   0x2   :  { %s589_s17 = smov 0   ;;  %s591_s18 = smov 0  }
   0x3 LB: > { %s606_s19 = sadd.s32 4294967295, %s553_s18   ;;  %s408_s20 = sadd.s32 4294967294, %s553_s18   ;;  %s553_s18 = sphi %s591_s18, %s714_s18   ;;  %s549_s17 = sphi %s589_s17, %s713_s17   ;;  %s545_s16 = sphi %s587_s16, %s712_s16   ;;  %s541_s15 = sphi %s585_s15, %s711_s15  }
   0x4   : > { %s610_s21 = sadd.s32 1, %s553_s18   ;;  %s93_s22 = sadd.s32 1, %s549_s17 }
   0x5   : > { %s90_s23 = ssub.s32 %s553_s18, %s610_s21  ;;  %p103_p0 = scmp.ne.s32.totalorder %s549_s17, %s545_s16 }
   0x6   : > { %p91_p1 = scmp.eq.s32.totalorder %s90_s23, 0  ;;  %p104_p2 = scmp.eq.s32.totalorder %s606_s19, 1 }
   0x7   : > { %p109_p3 = scmp.ne.s32.totalorder %s545_s16, %s541_s15  ;;  %p110_p4 = scmp.eq.s32.totalorder %s408_s20, 1 }
   0x8   : > { %s621_s24 = scalar_select %p91_p1, %s549_s17, %s93_s22  }
   0x9   : > { %p623_p5 = por %p104_p2, %p103_p0  ;;  %p627_p6 = por %p110_p4, %p109_p3 }
   0xa   : > { %p411_p7 = scmp.ge.s32.totalorder %s553_s18, 1  ;;  %p167_p8 = scmp.lt.s32.totalorder %s553_s18, 3 }
   0xc   : > { %p168_p9 = pnand %p411_p7, %p167_p8 }
   0xd   : > { %v205_v0 = vld [vmem:[%s705_s1] sm:$0xff] (!%p168_p9)  ;;  %v206_v1 = vld [vmem:[%s705_s1 + $0x8] sm:$0xff] (!%p168_p9)  ;;  %v207_v2 = vld [vmem:[%s705_s1 + $0x10] sm:$0xff] (!%p168_p9)  ;;  %v555_v3 = vmov (!%p168_p9), 0.0|0.0   ;;  %vm556_vm0 = vmmov (!%p168_p9), 0   ;;  %v557_v6 = vmov (!%p168_p9), 0.0  }
   0xe   : > { %171 = sbr.rel (%p168_p9) target bundleno = 393 (0x189), region = 32  ;;  %438 = vmatprep.subr.bf16.mxu0 (!%p168_p9), %v555_v3  ;;  %v439_v4 = vpack.c.bf16 (!%p168_p9), %v206_v1, %v205_v0  ;;  %v208_v5 = vld [vmem:[%s705_s1 + $0x18] sm:$0xff] (!%p168_p9)  ;;  %435 = vmatprep.mubr.msk.f32.mxu0 (!%p168_p9), %vm556_vm0, %v557_v6  ;;  %p196_p10 = scmp.lt.s32.totalorder (!%p168_p9), %s606_s19, 1  ;;  %vm216_vm1 = vcmask (!%p168_p9), 261120   ;;  %v415_v9 = vld [vmem:[%s706_s2] ss:$0 sm:$0xff] (!%p168_p9) }
   0xf   : > { %v442_v7 = vpack.c.bf16 (!%p168_p9), %v208_v5, %v207_v2  ;;  %s187_s14 = sand.u32 (!%p168_p9), 1, %s545_s16   ;;  %vm290_vm2 = vcmask (!%p168_p9), 130048   ;;  %s419_s28 = sshll.u32 (!%p168_p9), %s606_s19, 7 }
  0x10   : > { %440 = vmatpush3.bf16.msra.mxu0 (!%p168_p9), %v439_v4  ;;  %s412_s20 = sshll.u32 (!%p168_p9), %s187_s14, 3  ;;  %s663_s6 = scalar_lea.hbm (!%p168_p9), %s707_s3, %s419_s28 }
  0x11   : > { %441 = vmatprep.subr.bf16.mxu0 (!%p168_p9), %v555_v3  ;;  %s189_s27 = scalar_lea.vmem (!%p168_p9), [#allocation2], %s412_s20  ;;  %s305_s7 = scalar_lea.sflag (!%p168_p9), [#allocation3], %s187_s14 }
  0x12   : > { %s322_s29 = sshll.u32 (!%p168_p9), %s189_s27, 4  ;;  %s558_s11 = smov (!%p168_p9), [#allocation2]   ;;  %s323_s29 = int_to_ptr.vmem [resolvable:$true] %s322_s29 }
  0x13   : > { %s491_s8 = scalar_lea.vmem (!%p168_p9), %s323_s29, 128  ;;  %s495_s12 = sshll.u32 (!%p168_p9), %s558_s11, 4  ;;  %s496_s12 = int_to_ptr.vmem [resolvable:$false] %s495_s12 }
  0x14   : > { %443 = vmatpush3.bf16.msra.mxu0 (!%p168_p9), %v442_v7  ;;  %p492_p11 = scmp.ne.s32.totalorder (!%p168_p9), %s323_s29, %s491_s8  ;;  %p498_p0 = scmp.lt.s32.totalorder (!%p168_p9), %s323_s29, %s496_s12 }
  0x15   : > { %s647_s9 = scalar_select %p196_p10, %s606_s19, 1 }
  0x16   : > { %p493_p12 = pnand %p492_p11, %p623_p5 }
  0x17   : > { %s413_s10 = sshll.u32 %s647_s9, 3 }
  0x18   : > { %s199_s13 = scalar_lea.vmem %s704_s0, %s413_s10  ;;  %p494_p13 = pneg %p493_p12 }
  0x19   : > { %v204_v8 = vld [vmem:[%s199_s13] sm:$0xff]  ;;  %s497_s13 = scalar_lea.vmem %s496_s12, 256 }
  0x1a   : > { %436 = vmatmul.mubr.msk.f32.vlgmr.msra.gmra.mrb[0].mxu0 %vm216_vm1, %v204_v8  ;;  %p499_p1 = scmp.lt.s32.totalorder %s497_s13, %s491_s8 }
  0x1c   : > { %p500_p2 = por %p499_p1, %p498_p0 }
  0x1e   : > { %p501_p3 = pnand %p500_p2, %p494_p13 }
  0xed   : > { %v286_v10 = vpop.f32.mrb[0].mxu0 }
  0xee   : > { %v287_v11 = vadd.f32 %v415_v9, %v286_v10  ;;  %v437_v12 = vpop.f32.mrb[1].mxu0 }
  0xf0   : > { %v417_v13 = vmul.f32 -1.442695, %v287_v11  ;;  %291 = vst.msk [vmem:[%s189_s27] sm:$0xff] %vm290_vm2, %v287_v11 }
  0xf2   : > { %487 = vpow2.f32 %v417_v13 }
  0xfc   : > { %v488_v14 = vpop.eup %487 }
  0xfd   : > { %v295_v15 = vadd.f32 1.0, %v488_v14 }
  0xfe   : > { %504 = shalt.err (!%p501_p3)
}
  0xff   : > { %s505_s19 = scalar_lea.hbm %s663_s6, 128  ;;  %s509_s22 = scalar_lea.hbm %s707_s3, 256 }
 0x100   : > { %p506_p4 = scmp.ne.s32.totalorder %s663_s6, %s505_s19  ;;  %p510_p9 = scmp.lt.u32.totalorder %s663_s6, %s707_s3 }
 0x101   : > { %p511_p10 = scmp.lt.u32.totalorder %s509_s22, %s505_s19  ;;  %p513_p12 = scmp.lt.u32.totalorder %s505_s19, %s663_s6 }
 0x102   : > { %p507_p7 = pnand %p506_p4, %p623_p5 }
 0x103   : > { %p512_p11 = por %p511_p10, %p510_p9 }
 0x104   : > { %p508_p8 = pneg %p507_p7 }
 0x105   : > { %p514_p13 = por %p513_p12, %p512_p11 }
 0x107   : > { %p515_p0 = pnand %p514_p13, %p508_p8 }
 0x109   : > { %518 = shalt.err (!%p515_p0)
}
 0x10a   : > { %444 = dma.vmem_to_hbm [thread:$0]  (%p623_p5), %s323_s29, 128, %s663_s6, %s305_s7   ;;  %489 = vrcp.f32 %v295_v15  ;;  %vm302_vm3 = vcmask 7168  }
 0x10b   : > { %s559_s28 = smov 112   ;;  %s203_s8 = scalar_lea.vmem %s708_s4, %s413_s10 }
 0x114   : > { %v490_v16 = vpop.eup %489 }
 0x115   : > { %299 = vrot.lane.b32.xlu0 %v490_v16, %s559_s28 }
 0x187   : > { %v300_v17 = vpop.permute.xlu0 %299 }
 0x188   : > { %303 = vst.msk [vmem:[%s203_s8] sm:$0xff] %vm302_vm3, %v300_v17 }
 0x189 PF: > { %p450_p1 = scmp.ge.s32.totalorder %s553_s18, 2  ;;  %s337_s25 = sand.u32 1, %s541_s15  }
 0x18a   : > { %s338_s29 = scalar_lea.sflag [#allocation3], %s337_s25 }
 0x18b   : > { %p447_p5 = pnand %p450_p1, %p627_p6 }
 0x18d   : > { %536 = dma.done.wait (!%p447_p5), %s338_s29, 128  }
 0x18e   : > { %538 = vsyncadd (!%p447_p5), %s338_s29, 4294967168  ;;  %p15_p2 = scmp.ge.s32.totalorder %s610_s21, 4   ;;  %s711_s15 = smov %s545_s16 }
 0x18f   : > { %s712_s16 = smov %s549_s17  ;;  %s713_s17 = smov %s621_s24 }
 0x190   : > { %s714_s18 = smov %s610_s21  ;;  %17 = sbr.rel (!%p15_p2) target bundleno = 3 (0x3), region = 79 }
 0x197   :  { %350 = vsyncpa [#allocation3], 1 }
 0x198   :  { %352 = vsyncpa [#allocation3 + $0x1], 1 }

</bundles_post_ra>
